<compile_context>
chip_gen: v7x
topology: tpu7x:2x2x1
jax: 0.10.0
libtpu: 0.0.40
codegen_flags: <defaults>
</compile_context>

<pallas_src>
import functools

import jax
import jax.numpy as jnp
from jax.experimental import pallas as pl
from jax.experimental.pallas import tpu as pltpu

LN_EPS = 1e-5  # PyTorch nn.LayerNorm default


def _round_up(x, m):
    return ((x + m - 1) // m) * m


def _layernorm(x, gamma, beta):
    # PyTorch LayerNorm: biased variance over the last dim; math kept in f32.
    mu = jnp.mean(x, axis=-1, keepdims=True)
    var = jnp.mean((x - mu) ** 2, axis=-1, keepdims=True)
    return (x - mu) * jax.lax.rsqrt(var + LN_EPS) * gamma + beta


def critic_kernel(state_ref, action_ref, w1_ref, w2a_ref, vec_ref, q_ref,
                  *, fc1_dims, fc2_dims, compute_dtype):
    f32 = jnp.float32

    # Packed small params (single (8, W) f32 slab), sliced per row.
    b1 = vec_ref[0:1, :fc1_dims]
    g1 = vec_ref[1:2, :fc1_dims]
    be1 = vec_ref[2:3, :fc1_dims]
    b2a = vec_ref[3:4, :2 * fc2_dims]
    g2 = vec_ref[4:5, :fc2_dims]
    be2 = vec_ref[5:6, :fc2_dims]
    wq_row = vec_ref[6:7, :fc2_dims]
    bq = vec_ref[7:8, 0:1]

    # fc1 -> LayerNorm -> relu  (MXU dot, f32 accumulation; LN in f32)
    x = jnp.dot(state_ref[...], w1_ref[...], preferred_element_type=f32) + b1
    x = _layernorm(x, g1, be1)
    x = jnp.maximum(x, 0.0)

    # Fused fc2 + action_value: one MXU push against the block-diagonal weight.
    xa = jnp.concatenate([x.astype(compute_dtype), action_ref[...]], axis=-1)
    y = jnp.dot(xa, w2a_ref[...], preferred_element_type=f32) + b2a
    x2 = _layernorm(y[:, :fc2_dims], g2, be2)        # state branch (no relu yet)
    a = jnp.maximum(y[:, fc2_dims:], 0.0)            # action branch relu

    sa = jnp.maximum(x2 + a, 0.0)                    # [TB, fc2] f32

    # Lane-dense Q head: (1, fc2) @ (fc2, TB) -> (1, TB); wrapper slices/reshapes to (B, 1).
    q_ref[...] = jnp.dot(wq_row, sa.T, preferred_element_type=f32) + bq


@functools.partial(jax.jit, static_argnames=("compute_dtype", "batch_tile"))
def critic_forward(state, action, params, *, compute_dtype=jnp.float32,
                   batch_tile=512):
    (w1, b1, g1, be1, w2, b2, g2, be2, wa, ba, wq, bq) = params
    B, input_dim = state.shape
    n_act = action.shape[1]
    fc1 = w1.shape[1]
    fc2 = w2.shape[1]
    cd = jnp.dtype(compute_dtype)

    # --- batch tiling: TB is a multiple of 128, pad B up to a multiple of TB -------------
    tb = min(batch_tile, _round_up(B, 128))
    tb = _round_up(tb, 128)
    b_pad = _round_up(B, tb)
    if b_pad != B:
        state = jnp.pad(state, ((0, b_pad - B), (0, 0)))
        action = jnp.pad(action, ((0, b_pad - B), (0, 0)))

    state = state.astype(cd)
    action = action.astype(cd)

    # --- fused block-diagonal weight for [fc2 | action_value] ----------------------------
    w2a = jnp.zeros((fc1 + n_act, 2 * fc2), jnp.float32)
    w2a = w2a.at[:fc1, :fc2].set(w2)
    w2a = w2a.at[fc1:, fc2:].set(wa)
    w1c = w1.astype(cd)
    w2a = w2a.astype(cd)

    # --- pack all small vectors into a single (8, W) f32 slab ----------------------------
    W = max(fc1, 2 * fc2)

    def row(v):
        v = jnp.asarray(v, jnp.float32).reshape(1, -1)
        return jnp.pad(v, ((0, 0), (0, W - v.shape[1])))

    vecs = jnp.concatenate([
        row(b1), row(g1), row(be1),
        row(jnp.concatenate([b2.reshape(1, -1), ba.reshape(1, -1)], axis=-1)),
        row(g2), row(be2),
        row(wq.reshape(-1)),           # q head weight as a (1, fc2) row
        row(bq.reshape(-1)),           # q head bias in column 0
    ], axis=0)                         # (8, W) f32

    kernel = functools.partial(critic_kernel, fc1_dims=fc1, fc2_dims=fc2,
                               compute_dtype=cd)

    q_lane = pl.pallas_call(
        kernel,
        out_shape=jax.ShapeDtypeStruct((1, b_pad), jnp.float32),
        grid_spec=pltpu.PrefetchScalarGridSpec(
            num_scalar_prefetch=0,
            grid=(b_pad // tb,),
            in_specs=[
                pl.BlockSpec((tb, input_dim), lambda i: (i, 0)),          # state tile
                pl.BlockSpec((tb, n_act), lambda i: (i, 0)),              # action tile
                pl.BlockSpec((input_dim, fc1), lambda i: (0, 0)),         # w1 (resident)
                pl.BlockSpec((fc1 + n_act, 2 * fc2), lambda i: (0, 0)),   # fused w (resident)
                pl.BlockSpec((8, W), lambda i: (0, 0)),                   # packed vectors
            ],
            out_specs=pl.BlockSpec((1, tb), lambda i: (0, i)),            # lane-dense q
        ),
        compiler_params=pltpu.CompilerParams(
            dimension_semantics=("parallel",)),
    )(state, action, w1c, w2a, vecs)

    return q_lane[0, :B].reshape(B, 1)


def init_params(key, input_dim, fc1_dims, fc2_dims, n_actions):
    """Deterministic init mirroring CriticNetwork.__init__ (shapes + uniform ranges)."""
    ks = jax.random.split(key, 8)
    f1 = 1.0 / jnp.sqrt(fc1_dims)        # fc1.weight.size()[0] == fc1_dims
    f2 = 1.0 / jnp.sqrt(fc2_dims)        # np.sqrt(fc2.weight.size())[0] == sqrt(fc2_dims)
    f3 = 0.003
    fa = 1.0 / jnp.sqrt(n_actions)       # default PyTorch Linear init bound

    def U(k, shape, bound):
        return jax.random.uniform(k, shape, jnp.float32, -bound, bound)

    w1 = U(ks[0], (input_dim, fc1_dims), f1)
    b1 = U(ks[1], (1, fc1_dims), f1)
    g1 = jnp.ones((1, fc1_dims), jnp.float32)    # LayerNorm gamma
    be1 = jnp.zeros((1, fc1_dims), jnp.float32)  # LayerNorm beta

    w2 = U(ks[2], (fc1_dims, fc2_dims), f2)
    b2 = U(ks[3], (1, fc2_dims), f2)
    g2 = jnp.ones((1, fc2_dims), jnp.float32)
    be2 = jnp.zeros((1, fc2_dims), jnp.float32)

    wa = U(ks[4], (n_actions, fc2_dims), fa)
    ba = U(ks[5], (1, fc2_dims), fa)

    wq = U(ks[6], (fc2_dims, 1), f3)
    bq = U(ks[7], (1, 1), f3)

    return (w1, b1, g1, be1, w2, b2, g2, be2, wa, ba, wq, bq)


def reference_forward(state, action, params, compute_dtype=jnp.float32):
    """Pure-JAX reference mirroring the kernel's compute dtypes (bf16 MXU inputs, f32 accum)."""
    (w1, b1, g1, be1, w2, b2, g2, be2, wa, ba, wq, bq) = params
    cd = jnp.dtype(compute_dtype)
    f32 = jnp.float32
    s = state.astype(cd)
    act = action.astype(cd)
    x = jnp.dot(s, w1.astype(cd), preferred_element_type=f32) + b1
    x = _layernorm(x, g1, be1)
    x = jnp.maximum(x, 0.0)
    x2 = jnp.dot(x.astype(cd), w2.astype(cd), preferred_element_type=f32) + b2
    x2 = _layernorm(x2, g2, be2)
    a = jnp.maximum(jnp.dot(act, wa.astype(cd), preferred_element_type=f32) + ba, 0.0)
    sa = jnp.maximum(x2 + a, 0.0)
    return jnp.dot(sa, wq, preferred_element_type=f32) + bq


def _default_compute_dtype():
    # bf16 MXU inputs on v6e/v7x (f32 accumulation); f32 on v5e and older generations.
    try:
        kind = jax.devices()[0].device_kind.lower()
    except Exception:
        return jnp.float32
    for old in ("v2", "v3", "v4", "v5"):
        if old in kind:
            return jnp.float32
    return jnp.bfloat16


if __name__ == "__main__":
    # Small LunarLanderContinuous-like shapes.
    B, INPUT_DIM, FC1, FC2, N_ACT = 24, 8, 64, 32, 2

    key = jax.random.PRNGKey(0)
    k_state, k_action, k_params = jax.random.split(key, 3)

    state = jax.random.normal(k_state, (B, INPUT_DIM), jnp.float32)
    action = jax.random.normal(k_action, (B, N_ACT), jnp.float32)
    params = init_params(k_params, INPUT_DIM, FC1, FC2, N_ACT)

    compute_dtype = _default_compute_dtype()

    q = critic_forward(state, action, params, compute_dtype=compute_dtype)
    q = jax.block_until_ready(q)

    q_ref = reference_forward(state, action, params, compute_dtype=compute_dtype)
    assert q.shape == (B, 1)
    tol = 1e-5 if jnp.dtype(compute_dtype) == jnp.dtype(jnp.float32) else 2e-2
    assert jnp.allclose(q, q_ref, atol=tol, rtol=tol), float(jnp.max(jnp.abs(q - q_ref)))

    print("KERNEL_OK")
</pallas_src>

<mosaic_0001>
module attributes {stable_mosaic.version = 11 : i64} {
  func.func @critic_kernel(%arg0: i32, %arg1: memref<128x8xbf16, #tpu.memory_space<vmem>>, %arg2: memref<128x2xbf16, #tpu.memory_space<vmem>>, %arg3: memref<8x64xbf16, #tpu.memory_space<vmem>>, %arg4: memref<66x64xbf16, #tpu.memory_space<vmem>>, %arg5: memref<8x64xf32, #tpu.memory_space<vmem>>, %arg6: memref<1x128xf32, #tpu.memory_space<vmem>>) attributes {dimension_semantics = [#tpu.dimension_semantics<parallel>], iteration_bounds = array<i64: 1>, scalar_prefetch = 0 : i64, scratch_operands = 0 : i64, tpu.core_type = #tpu.core_type<tc>, window_params = [{transform_indices = @transform_0, window_bounds = array<i64: 128, 8>}, {transform_indices = @transform_1, window_bounds = array<i64: 128, 2>}, {pipeline_mode = #tpu.pipeline_mode<synchronous>, transform_indices = @transform_2, window_bounds = array<i64: 8, 64>}, {pipeline_mode = #tpu.pipeline_mode<synchronous>, transform_indices = @transform_3, window_bounds = array<i64: 66, 64>}, {pipeline_mode = #tpu.pipeline_mode<synchronous>, transform_indices = @transform_4, window_bounds = array<i64: 8, 64>}, {transform_indices = @transform_5, window_bounds = array<i64: 1, 128>}]} {
    %c0 = arith.constant 0 : index
    %c0_0 = arith.constant 0 : index
    %0 = vector.load %arg5[%c0, %c0_0] : memref<8x64xf32, #tpu.memory_space<vmem>>, vector<1x64xf32>
    %c1 = arith.constant 1 : index
    %c0_1 = arith.constant 0 : index
    %1 = vector.load %arg5[%c1, %c0_1] : memref<8x64xf32, #tpu.memory_space<vmem>>, vector<1x64xf32>
    %c2 = arith.constant 2 : index
    %c0_2 = arith.constant 0 : index
    %2 = vector.load %arg5[%c2, %c0_2] : memref<8x64xf32, #tpu.memory_space<vmem>>, vector<1x64xf32>
    %c3 = arith.constant 3 : index
    %c0_3 = arith.constant 0 : index
    %3 = vector.load %arg5[%c3, %c0_3] : memref<8x64xf32, #tpu.memory_space<vmem>>, vector<1x64xf32>
    %c4 = arith.constant 4 : index
    %c0_4 = arith.constant 0 : index
    %4 = vector.load %arg5[%c4, %c0_4] : memref<8x64xf32, #tpu.memory_space<vmem>>, vector<1x32xf32>
    %c5 = arith.constant 5 : index
    %c0_5 = arith.constant 0 : index
    %5 = vector.load %arg5[%c5, %c0_5] : memref<8x64xf32, #tpu.memory_space<vmem>>, vector<1x32xf32>
    %c6 = arith.constant 6 : index
    %c0_6 = arith.constant 0 : index
    %6 = vector.load %arg5[%c6, %c0_6] : memref<8x64xf32, #tpu.memory_space<vmem>>, vector<1x32xf32>
    %c7 = arith.constant 7 : index
    %c0_7 = arith.constant 0 : index
    %7 = vector.load %arg5[%c7, %c0_7] : memref<8x64xf32, #tpu.memory_space<vmem>>, vector<1x1xf32>
    %c0_8 = arith.constant 0 : index
    %c0_9 = arith.constant 0 : index
    %8 = vector.load %arg1[%c0_8, %c0_9] : memref<128x8xbf16, #tpu.memory_space<vmem>>, vector<128x8xbf16>
    %c0_10 = arith.constant 0 : index
    %c0_11 = arith.constant 0 : index
    %9 = vector.load %arg3[%c0_10, %c0_11] : memref<8x64xbf16, #tpu.memory_space<vmem>>, vector<8x64xbf16>
    %cst = arith.constant dense<0.000000e+00> : vector<128x64xf32>
    %10 = tpu.matmul %8, %9, %cst {dimension_numbers = #tpu.dot_dimension_numbers<[1], [0], [0], [1], [0, 0, 1, 1], [], []>} : vector<128x8xbf16>, vector<8x64xbf16>, vector<128x64xf32> -> vector<128x64xf32>
    %11 = vector.broadcast %0 : vector<1x64xf32> to vector<128x64xf32>
    %12 = arith.addf %10, %11 : vector<128x64xf32>
    %cst_12 = arith.constant dense<0.000000e+00> : vector<128xf32>
    %13 = vector.multi_reduction <add>, %12, %cst_12 [1] : vector<128x64xf32> to vector<128xf32>
    %14 = vector.shape_cast %13 : vector<128xf32> to vector<128x1xf32>
    %cst_13 = arith.constant 6.400000e+01 : f32
    %15 = vector.broadcast %cst_13 : f32 to vector<128x1xf32>
    %16 = arith.divf %14, %15 : vector<128x1xf32>
    %17 = vector.broadcast %16 : vector<128x1xf32> to vector<128x64xf32>
    %18 = arith.subf %12, %17 : vector<128x64xf32>
    %19 = arith.mulf %18, %18 : vector<128x64xf32>
    %cst_14 = arith.constant dense<0.000000e+00> : vector<128xf32>
    %20 = vector.multi_reduction <add>, %19, %cst_14 [1] : vector<128x64xf32> to vector<128xf32>
    %21 = vector.shape_cast %20 : vector<128xf32> to vector<128x1xf32>
    %cst_15 = arith.constant 6.400000e+01 : f32
    %22 = vector.broadcast %cst_15 : f32 to vector<128x1xf32>
    %23 = arith.divf %21, %22 : vector<128x1xf32>
    %24 = vector.broadcast %16 : vector<128x1xf32> to vector<128x64xf32>
    %25 = arith.subf %12, %24 : vector<128x64xf32>
    %cst_16 = arith.constant 9.99999974E-6 : f32
    %26 = vector.broadcast %cst_16 : f32 to vector<128x1xf32>
    %27 = arith.addf %23, %26 : vector<128x1xf32>
    %28 = math.rsqrt %27 : vector<128x1xf32>
    %29 = vector.broadcast %28 : vector<128x1xf32> to vector<128x64xf32>
    %30 = arith.mulf %25, %29 : vector<128x64xf32>
    %31 = vector.broadcast %1 : vector<1x64xf32> to vector<128x64xf32>
    %32 = arith.mulf %30, %31 : vector<128x64xf32>
    %33 = vector.broadcast %2 : vector<1x64xf32> to vector<128x64xf32>
    %34 = arith.addf %32, %33 : vector<128x64xf32>
    %cst_17 = arith.constant 0.000000e+00 : f32
    %35 = vector.broadcast %cst_17 : f32 to vector<128x64xf32>
    %36 = arith.maximumf %34, %35 : vector<128x64xf32>
    %37 = arith.truncf %36 : vector<128x64xf32> to vector<128x64xbf16>
    %c0_18 = arith.constant 0 : index
    %c0_19 = arith.constant 0 : index
    %38 = vector.load %arg2[%c0_18, %c0_19] : memref<128x2xbf16, #tpu.memory_space<vmem>>, vector<128x2xbf16>
    %39 = tpu.concatenate %37, %38 in 1 : vector<128x64xbf16>, vector<128x2xbf16> -> vector<128x66xbf16>
    %c0_20 = arith.constant 0 : index
    %c0_21 = arith.constant 0 : index
    %40 = vector.load %arg4[%c0_20, %c0_21] : memref<66x64xbf16, #tpu.memory_space<vmem>>, vector<66x64xbf16>
    %cst_22 = arith.constant dense<0.000000e+00> : vector<128x64xf32>
    %41 = tpu.matmul %39, %40, %cst_22 {dimension_numbers = #tpu.dot_dimension_numbers<[1], [0], [0], [1], [0, 0, 1, 1], [], []>} : vector<128x66xbf16>, vector<66x64xbf16>, vector<128x64xf32> -> vector<128x64xf32>
    %42 = vector.broadcast %3 : vector<1x64xf32> to vector<128x64xf32>
    %43 = arith.addf %41, %42 : vector<128x64xf32>
    %44 = vector.extract_strided_slice %43 {offsets = [0, 0], sizes = [128, 32], strides = [1, 1]} : vector<128x64xf32> to vector<128x32xf32>
    %cst_23 = arith.constant dense<0.000000e+00> : vector<128xf32>
    %45 = vector.multi_reduction <add>, %44, %cst_23 [1] : vector<128x32xf32> to vector<128xf32>
    %46 = vector.shape_cast %45 : vector<128xf32> to vector<128x1xf32>
    %cst_24 = arith.constant 3.200000e+01 : f32
    %47 = vector.broadcast %cst_24 : f32 to vector<128x1xf32>
    %48 = arith.divf %46, %47 : vector<128x1xf32>
    %49 = vector.broadcast %48 : vector<128x1xf32> to vector<128x32xf32>
    %50 = arith.subf %44, %49 : vector<128x32xf32>
    %51 = arith.mulf %50, %50 : vector<128x32xf32>
    %cst_25 = arith.constant dense<0.000000e+00> : vector<128xf32>
    %52 = vector.multi_reduction <add>, %51, %cst_25 [1] : vector<128x32xf32> to vector<128xf32>
    %53 = vector.shape_cast %52 : vector<128xf32> to vector<128x1xf32>
    %cst_26 = arith.constant 3.200000e+01 : f32
    %54 = vector.broadcast %cst_26 : f32 to vector<128x1xf32>
    %55 = arith.divf %53, %54 : vector<128x1xf32>
    %56 = vector.broadcast %48 : vector<128x1xf32> to vector<128x32xf32>
    %57 = arith.subf %44, %56 : vector<128x32xf32>
    %cst_27 = arith.constant 9.99999974E-6 : f32
    %58 = vector.broadcast %cst_27 : f32 to vector<128x1xf32>
    %59 = arith.addf %55, %58 : vector<128x1xf32>
    %60 = math.rsqrt %59 : vector<128x1xf32>
    %61 = vector.broadcast %60 : vector<128x1xf32> to vector<128x32xf32>
    %62 = arith.mulf %57, %61 : vector<128x32xf32>
    %63 = vector.broadcast %4 : vector<1x32xf32> to vector<128x32xf32>
    %64 = arith.mulf %62, %63 : vector<128x32xf32>
    %65 = vector.broadcast %5 : vector<1x32xf32> to vector<128x32xf32>
    %66 = arith.addf %64, %65 : vector<128x32xf32>
    %67 = vector.extract_strided_slice %43 {offsets = [0, 32], sizes = [128, 32], strides = [1, 1]} : vector<128x64xf32> to vector<128x32xf32>
    %cst_28 = arith.constant 0.000000e+00 : f32
    %68 = vector.broadcast %cst_28 : f32 to vector<128x32xf32>
    %69 = arith.maximumf %67, %68 : vector<128x32xf32>
    %70 = arith.addf %66, %69 : vector<128x32xf32>
    %cst_29 = arith.constant 0.000000e+00 : f32
    %71 = vector.broadcast %cst_29 : f32 to vector<128x32xf32>
    %72 = arith.maximumf %70, %71 : vector<128x32xf32>
    %73 = tpu.transpose %72, [1, 0] : vector<128x32xf32> -> vector<32x128xf32>
    %cst_30 = arith.constant dense<0.000000e+00> : vector<1x128xf32>
    %74 = tpu.matmul %6, %73, %cst_30 {dimension_numbers = #tpu.dot_dimension_numbers<[1], [0], [0], [1], [0, 0, 1, 1], [], []>} : vector<1x32xf32>, vector<32x128xf32>, vector<1x128xf32> -> vector<1x128xf32>
    %75 = vector.broadcast %7 : vector<1x1xf32> to vector<1x128xf32>
    %76 = arith.addf %74, %75 : vector<1x128xf32>
    %c0_31 = arith.constant 0 : index
    %c0_32 = arith.constant 0 : index
    %77 = vector.load %arg6[%c0_31, %c0_32] : memref<1x128xf32, #tpu.memory_space<vmem>>, vector<1x128xf32>
    tpu.vector_store %arg6[%c0_31, %c0_32], %76 {strides = array<i32>} : memref<1x128xf32, #tpu.memory_space<vmem>>, vector<1x128xf32>,
    return
  }
  func.func @transform_0(%arg0: i32) -> (i32, i32) {
    %c0_i32 = arith.constant 0 : i32
    %c0_i32_0 = arith.constant 0 : i32
    return %arg0, %c0_i32 : i32, i32
  }
  func.func @transform_1(%arg0: i32) -> (i32, i32) {
    %c0_i32 = arith.constant 0 : i32
    %c0_i32_0 = arith.constant 0 : i32
    return %arg0, %c0_i32 : i32, i32
  }
  func.func @transform_2(%arg0: i32) -> (i32, i32) {
    %c0_i32 = arith.constant 0 : i32
    %c0_i32_0 = arith.constant 0 : i32
    %c0_i32_1 = arith.constant 0 : i32
    return %c0_i32, %c0_i32_0 : i32, i32
  }
  func.func @transform_3(%arg0: i32) -> (i32, i32) {
    %c0_i32 = arith.constant 0 : i32
    %c0_i32_0 = arith.constant 0 : i32
    %c0_i32_1 = arith.constant 0 : i32
    return %c0_i32, %c0_i32_0 : i32, i32
  }
  func.func @transform_4(%arg0: i32) -> (i32, i32) {
    %c0_i32 = arith.constant 0 : i32
    %c0_i32_0 = arith.constant 0 : i32
    %c0_i32_1 = arith.constant 0 : i32
    return %c0_i32, %c0_i32_0 : i32, i32
  }
  func.func @transform_5(%arg0: i32) -> (i32, i32) {
    %c0_i32 = arith.constant 0 : i32
    %c0_i32_0 = arith.constant 0 : i32
    return %c0_i32, %arg0 : i32, i32
  }
}

</mosaic_0001>

<bundles_post_ra>
// kernel: critic_forward.1
= control target key start
LH: loop header
LB: loop body
LE: loop exit
PB: predicated region body
PF: predicated region fallthrough
CT: control target
= control target key end

     0   :  { %vm115_vm0 = vcmask 1043456   ;;  %vm90_vm1 = vcmask 64512   ;;  %vm216_vm2 = vcmask 523264   ;;  %s1541_s13 = smov 64   ;;  %vm643_vm3 = vcmask 1040384   ;;  %s1542_s15 = smov 96   ;;  %s2216_s2 = inlined_call_operand.vmem [shape: bf16[8,64], index: 2, kind: input, shape index: {}]   ;;  %s2217_s0 = inlined_call_operand.vmem [shape: bf16[128,8], index: 0, kind: input, shape index: {}]   ;;  %s2218_s1 = inlined_call_operand.vmem [shape: bf16[128,2], index: 1, kind: input, shape index: {}]   ;;  %s2219_s4 = inlined_call_operand.vmem [shape: f32[8,64], index: 4, kind: input, shape index: {}]   ;;  %s2220_s3 = inlined_call_operand.vmem [shape: bf16[66,64], index: 3, kind: input, shape index: {}]   ;;  %s2221_s5 = inlined_call_operand.vmem [shape: f32[1,128], index: 5, kind: output, shape index: {}]  }
   0x1   :  { %v45_v0 = vld [vmem:[%s2216_s2] sm:$0xf]  ;;  %v1457_v3 = vld [vmem:[%s2217_s0 + $0x8] sm:$0xff]   ;;  %v1458_v4 = vld [vmem:[%s2217_s0 + $0x10] sm:$0xff]   ;;  %vm626_vm4 = vcmask 539648   ;;  %vm744_vm5 = vcmask 261120  }
   0x2   :  { %1447 = vmatprep.subr.msk.bf16.mxu1 %vm115_vm0, %v45_v0  ;;  %v117_v1 = vsel %vm115_vm0, %v45_v0, 0  ;;  %v1456_v2 = vld [vmem:[%s2217_s0] sm:$0xff]   ;;  %v1459_v5 = vld [vmem:[%s2217_s0 + $0x18] sm:$0xff]   ;;  %v1461_v7 = vld [vmem:[%s2217_s0 + $0x28] sm:$0xff]   ;;  %vm1544_vm7 = vmmov 0  }
   0x3   :  { %1337 = vmatpush3.bf16.msra.mxu1 %v117_v1  ;;  %1338 = vmatprep.mubr.msk.bf16.mxu1 %vm90_vm1, %v1456_v2  ;;  %v1460_v6 = vld [vmem:[%s2217_s0 + $0x20] sm:$0xff]   ;;  %v1462_v8 = vld [vmem:[%s2217_s0 + $0x30] sm:$0xff]   ;;  %v1463_v9 = vld [vmem:[%s2217_s0 + $0x38] sm:$0xff]  }
   0x4   :  { %v1237_v10 = vld [vmem:[%s2219_s4] ss:$0 sm:$0xff]  ;;  %v1464_v59 = vld [vmem:[%s2218_s1 + $0x8] sm:$0xff]   ;;  %vm2136_vm6 = vmpackc.low %vm744_vm5, %vm744_vm5 }
   0x5   :  { %v1465_v60 = vld [vmem:[%s2218_s1] sm:$0xff]  }
   0x6   :  { %1339 = vmatmul.mubr.msk.bf16.vlgmr.msra.gmra.mrb[0].mxu1 %vm90_vm1, %v1457_v3 }
   0x7   :  { %1342 = vmatprep.mubr.msk.bf16.mxu1 %vm90_vm1, %v1458_v4 }
   0xe   :  { %1343 = vmatmul.mubr.msk.bf16.gmra.mrb[4].mxu1 %vm90_vm1, %v1459_v5 }
   0xf   :  { %1346 = vmatprep.mubr.msk.bf16.mxu1 %vm90_vm1, %v1460_v6 }
  0x16   :  { %1347 = vmatmul.mubr.msk.bf16.gmra.mrb[8].mxu1 %vm90_vm1, %v1461_v7 }
  0x17   :  { %1350 = vmatprep.mubr.msk.bf16.mxu1 %vm90_vm1, %v1462_v8 }
  0x1e   :  { %1351 = vmatmul.mubr.msk.bf16.gmra.mrb[12].mxu1 %vm90_vm1, %v1463_v9 }
  0xd9   :  { %v1340_v11 = vpop.f32.mrb[0].mxu1 }
  0xda   :  { %v1615_v12 = vadd.f32 %v1340_v11, %v1237_v10  ;;  %v153_v13 = vpop.f32.mrb[1].mxu1 }
  0xdb   :  { %v1617_v14 = vadd.f32 %v1237_v10, %v153_v13  ;;  %v1341_v15 = vpop.f32.mrb[2].mxu1 }
  0xdc   :  { %v1619_v16 = vadd.f32 %v1341_v15, %v1237_v10  ;;  %v156_v17 = vpop.f32.mrb[3].mxu1  ;;  %v223_v18 = vsel %vm216_vm2, %v1615_v12, 0.0 }
  0xdd   :  { %v1623_v19 = vadd.f32 %v1237_v10, %v156_v17  ;;  %224 = vadd.xlane.f32.xlu1 %v223_v18  ;;  %v217_v20 = vsel %vm216_vm2, %v1617_v14, 0.0 }
  0xde   :  { %218 = vadd.xlane.f32.xlu0 %v217_v20  ;;  %v226_v21 = vsel %vm216_vm2, %v1619_v16, 0.0 }
  0xdf   :  { %v220_v23 = vsel %vm216_vm2, %v1623_v19, 0.0 }
  0xe1   :  { %227 = vadd.xlane.f32.xlu1 %v226_v21  ;;  %v1344_v22 = vpop.f32.mrb[4].mxu1 }
  0xe2   :  { %v1631_v24 = vadd.f32 %v1344_v22, %v1237_v10  ;;  %v169_v25 = vpop.f32.mrb[5].mxu1  ;;  %221 = vadd.xlane.f32.xlu0 %v220_v23 }
  0xe3   :  { %v1633_v26 = vadd.f32 %v1237_v10, %v169_v25  ;;  %v1345_v27 = vpop.f32.mrb[6].mxu1 }
  0xe4   :  { %v1635_v28 = vadd.f32 %v1345_v27, %v1237_v10  ;;  %v235_v29 = vsel %vm216_vm2, %v1631_v24, 0.0  ;;  %v172_v30 = vpop.f32.mrb[7].mxu1 }
  0xe5   :  { %v1639_v31 = vadd.f32 %v1237_v10, %v172_v30  ;;  %v229_v33 = vsel %vm216_vm2, %v1633_v26, 0.0 }
  0xe6   :  { %236 = vadd.xlane.f32.xlu0 %v235_v29  ;;  %v238_v32 = vsel %vm216_vm2, %v1635_v28, 0.0 }
  0xe7   :  { %239 = vadd.xlane.f32.xlu1 %v238_v32  ;;  %v232_v34 = vsel %vm216_vm2, %v1639_v31, 0.0 }
  0xe9   :  { %v1348_v35 = vpop.f32.mrb[8].mxu1 }
  0xea   :  { %v1647_v36 = vadd.f32 %v1348_v35, %v1237_v10  ;;  %v185_v37 = vpop.f32.mrb[9].mxu1  ;;  %230 = vadd.xlane.f32.xlu0 %v229_v33 }
  0xeb   :  { %v1649_v38 = vadd.f32 %v1237_v10, %v185_v37  ;;  %v1349_v39 = vpop.f32.mrb[10].mxu1  ;;  %233 = vadd.xlane.f32.xlu1 %v232_v34 }
  0xec   :  { %v1651_v40 = vadd.f32 %v1349_v39, %v1237_v10  ;;  %v247_v41 = vsel %vm216_vm2, %v1647_v36, 0.0  ;;  %v188_v42 = vpop.f32.mrb[11].mxu1 }
  0xed   :  { %v1655_v43 = vadd.f32 %v1237_v10, %v188_v42  ;;  %v241_v45 = vsel %vm216_vm2, %v1649_v38, 0.0 }
  0xee   :  { %248 = vadd.xlane.f32.xlu0 %v247_v41  ;;  %v250_v44 = vsel %vm216_vm2, %v1651_v40, 0.0 }
  0xef   :  { %251 = vadd.xlane.f32.xlu1 %v250_v44  ;;  %v244_v46 = vsel %vm216_vm2, %v1655_v43, 0.0 }
  0xf1   :  { %v1352_v47 = vpop.f32.mrb[12].mxu1 }
  0xf2   :  { %v1663_v48 = vadd.f32 %v1352_v47, %v1237_v10  ;;  %v201_v49 = vpop.f32.mrb[13].mxu1  ;;  %242 = vadd.xlane.f32.xlu0 %v241_v45 }
  0xf3   :  { %v1665_v50 = vadd.f32 %v1237_v10, %v201_v49  ;;  %v1353_v51 = vpop.f32.mrb[14].mxu1  ;;  %245 = vadd.xlane.f32.xlu1 %v244_v46 }
  0xf4   :  { %v1667_v52 = vadd.f32 %v1353_v51, %v1237_v10  ;;  %v259_v53 = vsel %vm216_vm2, %v1663_v48, 0.0  ;;  %v204_v54 = vpop.f32.mrb[15].mxu1 }
  0xf5   :  { %v1671_v55 = vadd.f32 %v1237_v10, %v204_v54  ;;  %v253_v57 = vsel %vm216_vm2, %v1665_v50, 0.0 }
  0xf6   :  { %260 = vadd.xlane.f32.xlu0 %v259_v53  ;;  %v262_v56 = vsel %vm216_vm2, %v1667_v52, 0.0 }
  0xf7   :  { %263 = vadd.xlane.f32.xlu1 %v262_v56  ;;  %v256_v58 = vsel %vm216_vm2, %v1671_v55, 0.0 }
  0xfa   :  { %254 = vadd.xlane.f32.xlu0 %v253_v57 }
  0xfb   :  { %257 = vadd.xlane.f32.xlu1 %v256_v58 }
 0x10c   :  { %548 = vrot.lane.b32.xlu1 %v1464_v59, %s1541_s13 }
 0x110   :  { %546 = vrot.lane.b32.xlu0 %v1465_v60, %s1541_s13 }
 0x16a   :  { %v225_v61 = vpop.xlane.xlu1 %224 }
 0x16b   :  { %v268_v62 = vmul.f32 0.015625, %v225_v61  ;;  %v219_v63 = vpop.xlane.xlu0 %218 }
 0x16c   :  { %v266_v0 = vmul.f32 0.015625, %v219_v63 }
 0x16d   :  { %v1688_v1 = vsub.f32 %v1615_v12, %v268_v62 }
 0x16e   :  { %v1691_v2 = vsub.f32 %v1617_v14, %v266_v0  ;;  %v228_v3 = vpop.xlane.xlu1 %227 }
 0x16f   :  { %v269_v4 = vmul.f32 0.015625, %v228_v3  ;;  %v222_v5 = vpop.xlane.xlu0 %221  ;;  %v300_v6 = vmul.f32 %v1688_v1, %v1688_v1 }
 0x170   :  { %v267_v7 = vmul.f32 0.015625, %v222_v5  ;;  %v298_v10 = vmul.f32 %v1691_v2, %v1691_v2 }
 0x171   :  { %v1696_v8 = vsub.f32 %v1619_v16, %v269_v4  ;;  %v320_v9 = vsel %vm216_vm2, %v300_v6, 0.0 }
 0x172   :  { %v1702_v11 = vsub.f32 %v1623_v19, %v267_v7  ;;  %321 = vadd.xlane.f32.xlu0 %v320_v9  ;;  %v314_v16 = vsel %vm216_vm2, %v298_v10, 0.0 }
 0x173   :  { %v237_v12 = vpop.xlane.xlu0 %236  ;;  %v301_v13 = vmul.f32 %v1696_v8, %v1696_v8 }
 0x174   :  { %v272_v14 = vmul.f32 0.015625, %v237_v12  ;;  %v240_v15 = vpop.xlane.xlu1 %239  ;;  %v299_v20 = vmul.f32 %v1702_v11, %v1702_v11 }
 0x175   :  { %v273_v17 = vmul.f32 0.015625, %v240_v15  ;;  %v323_v18 = vsel %vm216_vm2, %v301_v13, 0.0 }
 0x176   :  { %v1711_v21 = vsub.f32 %v1631_v24, %v272_v14  ;;  %324 = vadd.xlane.f32.xlu1 %v323_v18  ;;  %315 = vadd.xlane.f32.xlu0 %v314_v16  ;;  %v317_v30 = vsel %vm216_vm2, %v299_v20, 0.0  ;;  %v1473_v16 = vld [vmem:[%s2220_s3 + $0x8] sm:$0xff]   ;;  %v1474_v20 = vld [vmem:[%s2220_s3 + $0x10] sm:$0xff]  }
 0x177   :  { %v1714_v19 = vsub.f32 %v1635_v28, %v273_v17  ;;  %v231_v22 = vpop.xlane.xlu0 %230 }
 0x178   :  { %v270_v23 = vmul.f32 0.015625, %v231_v22  ;;  %v234_v25 = vpop.xlane.xlu1 %233  ;;  %v304_v27 = vmul.f32 %v1711_v21, %v1711_v21  ;;  %v1475_v22 = vld [vmem:[%s2220_s3 + $0x18] sm:$0xff]  }
 0x179   :  { %v271_v29 = vmul.f32 0.015625, %v234_v25  ;;  %v305_v32 = vmul.f32 %v1714_v19, %v1714_v19  ;;  %v1466_v25 = vld [vmem:[%s2218_s1 + $0x18] sm:$0xff]  }
 0x17a   :  { %v1722_v24 = vsub.f32 %v1633_v26, %v270_v23  ;;  %318 = vadd.xlane.f32.xlu1 %v317_v30  ;;  %v332_v33 = vsel %vm216_vm2, %v304_v27, 0.0  ;;  %v1476_v23 = vld [vmem:[%s2220_s3 + $0x20] ss:$0 sps:$4 sm:$0x11]  }
 0x17b   :  { %v1726_v28 = vsub.f32 %v1639_v31, %v271_v29  ;;  %333 = vadd.xlane.f32.xlu0 %v332_v33  ;;  %v249_v34 = vpop.xlane.xlu0 %248  ;;  %v335_v42 = vsel %vm216_vm2, %v305_v32, 0.0  ;;  %v645_v27 = vsel %vm643_vm3, %v1476_v23, 0  ;;  %v1467_v29 = vld [vmem:[%s2218_s1 + $0x10] sm:$0xff]   ;;  %v1468_v30 = vld [vmem:[%s2218_s1 + $0x20] sm:$0xff]   ;;  %v1469_v33 = vld [vmem:[%s2218_s1 + $0x28] sm:$0xff]  }
 0x17c   :  { %v276_v35 = vmul.f32 0.015625, %v249_v34  ;;  %v252_v37 = vpop.xlane.xlu1 %251  ;;  %v302_v39 = vmul.f32 %v1722_v24, %v1722_v24  ;;  %v1470_v32 = vld [vmem:[%s2218_s1 + $0x30] sm:$0xff]   ;;  %v1471_v34 = vld [vmem:[%s2218_s1 + $0x38] sm:$0xff]  }
 0x17d   :  { %v277_v41 = vmul.f32 0.015625, %v252_v37  ;;  %v303_v26 = vmul.f32 %v1726_v28, %v1726_v28 }
 0x17e   :  { %v1734_v44 = vsub.f32 %v1647_v36, %v276_v35  ;;  %336 = vadd.xlane.f32.xlu1 %v335_v42  ;;  %v326_v31 = vsel %vm216_vm2, %v302_v39, 0.0 }
 0x17f   :  { %v1738_v45 = vsub.f32 %v1651_v40, %v277_v41  ;;  %327 = vadd.xlane.f32.xlu0 %v326_v31  ;;  %v243_v46 = vpop.xlane.xlu0 %242  ;;  %v329_v54 = vsel %vm216_vm2, %v303_v26, 0.0 }
 0x180   :  { %v274_v47 = vmul.f32 0.015625, %v243_v46  ;;  %v246_v49 = vpop.xlane.xlu1 %245  ;;  %v308_v51 = vmul.f32 %v1734_v44, %v1734_v44 }
 0x181   :  { %v275_v53 = vmul.f32 0.015625, %v246_v49  ;;  %v309_v36 = vmul.f32 %v1738_v45, %v1738_v45 }
 0x182   :  { %v1746_v56 = vsub.f32 %v1649_v38, %v274_v47  ;;  %330 = vadd.xlane.f32.xlu1 %v329_v54  ;;  %v344_v40 = vsel %vm216_vm2, %v308_v51, 0.0 }
 0x183   :  { %v1750_v57 = vsub.f32 %v1655_v43, %v275_v53  ;;  %345 = vadd.xlane.f32.xlu0 %v344_v40  ;;  %v261_v58 = vpop.xlane.xlu0 %260  ;;  %v347_v62 = vsel %vm216_vm2, %v309_v36, 0.0 }
 0x184   :  { %v280_v59 = vmul.f32 0.015625, %v261_v58  ;;  %v264_v60 = vpop.xlane.xlu1 %263  ;;  %v306_v61 = vmul.f32 %v1746_v56, %v1746_v56 }
 0x185   :  { %v307_v63 = vmul.f32 %v1750_v57, %v1750_v57  ;;  %v281_v0 = vmul.f32 0.015625, %v264_v60 }
 0x186   :  { %v1758_v38 = vsub.f32 %v1663_v48, %v280_v59  ;;  %348 = vadd.xlane.f32.xlu1 %v347_v62  ;;  %v338_v43 = vsel %vm216_vm2, %v306_v61, 0.0 }
 0x187   :  { %339 = vadd.xlane.f32.xlu0 %v338_v43  ;;  %v255_v3 = vpop.xlane.xlu0 %254  ;;  %v341_v9 = vsel %vm216_vm2, %v307_v63, 0.0  ;;  %v1765_v10 = vsub.f32 %v1667_v52, %v281_v0  ;;  %v1472_v52 = vld [vmem:[%s2220_s3] sm:$0xff]  }
 0x188   :  { %v278_v4 = vmul.f32 0.015625, %v255_v3  ;;  %v258_v5 = vpop.xlane.xlu1 %257  ;;  %v312_v6 = vmul.f32 %v1758_v38, %v1758_v38  ;;  %1354 = vmatprep.subr.bf16.mxu1 %v1472_v52 }
 0x189   :  { %v279_v7 = vmul.f32 0.015625, %v258_v5  ;;  %v313_v17 = vmul.f32 %v1765_v10, %v1765_v10  ;;  %1355 = vmatpush3.bf16.msra.mxu1 %v1472_v52 }
 0x18a   :  { %v1768_v48 = vsub.f32 %v1665_v50, %v278_v4  ;;  %342 = vadd.xlane.f32.xlu1 %v341_v9  ;;  %v356_v12 = vsel %vm216_vm2, %v312_v6, 0.0  ;;  %1356 = vmatprep.subr.bf16.mxu1 %v1473_v16  ;;  %v1830_v9 = vld [vmem:[%s2219_s4 + $0x1] ss:$0 sm:$0xff] }
 0x18b   :  { %v1772_v13 = vsub.f32 %v1671_v55, %v279_v7  ;;  %357 = vadd.xlane.f32.xlu0 %v356_v12  ;;  %v359_v18 = vsel %vm216_vm2, %v313_v17, 0.0  ;;  %v1822_v35 = vpop.permute.xlu0 %546 }
 0x18c   :  { %v310_v14 = vmul.f32 %v1768_v48, %v1768_v48  ;;  %v1824_v37 = vpop.permute.xlu1 %548 }
 0x18d   :  { %v311_v15 = vmul.f32 %v1772_v13, %v1772_v13  ;;  %1357 = vmatpush3.bf16.msra.mxu1 %v1473_v16 }
 0x18e   :  { %v350_v50 = vsel %vm216_vm2, %v310_v14, 0.0  ;;  %1358 = vmatprep.subr.bf16.mxu1 %v1474_v20 }
 0x18f   :  { %351 = vadd.xlane.f32.xlu1 %v350_v50  ;;  %v353_v55 = vsel %vm216_vm2, %v311_v15, 0.0 }
 0x190   :  { %354 = vadd.xlane.f32.xlu0 %v353_v55 }
 0x191   :  { %1359 = vmatpush3.bf16.msra.mxu1 %v1474_v20 }
 0x192   :  { %1360 = vmatprep.subr.bf16.mxu1 %v1475_v22 }
 0x193   :  { %360 = vadd.xlane.f32.xlu1 %v359_v18 }
 0x195   :  { %1361 = vmatpush3.bf16.msra.mxu1 %v1475_v22 }
 0x196   :  { %1448 = vmatprep.subr.msk.bf16.mxu1 %vm643_vm3, %v1476_v23 }
 0x199   :  { %1363 = vmatpush3.bf16.msra.mxu1 %v645_v27 }
 0x1a4   :  { %552 = vrot.lane.b32.xlu1 %v1466_v25, %s1541_s13  ;;  %v1839_v25 = vld [vmem:[%s2219_s4 + $0x2] ss:$0 sm:$0xff] }
 0x1a6   :  { %550 = vrot.lane.b32.xlu0 %v1467_v29, %s1541_s13 }
 0x1a8   :  { %554 = vrot.lane.b32.xlu1 %v1468_v30, %s1541_s13 }
 0x1aa   :  { %558 = vrot.lane.b32.xlu0 %v1470_v32, %s1541_s13 }
 0x1ac   :  { %556 = vrot.lane.b32.xlu1 %v1469_v33, %s1541_s13 }
 0x1b0   :  { %560 = vrot.lane.b32.xlu1 %v1471_v34, %s1541_s13 }
 0x1ff   :  { %v322_v39 = vpop.xlane.xlu0 %321 }
 0x200   :  { %v364_v41 = vmul.f32 0.015625, %v322_v39 }
 0x202   :  { %v380_v42 = vadd.f32 1e-05, %v364_v41 }
 0x203   :  { %v325_v26 = vpop.xlane.xlu1 %324  ;;  %v316_v31 = vpop.xlane.xlu0 %315 }
 0x204   :  { %1477 = vrsqrt.f32 %v380_v42  ;;  %v365_v46 = vmul.f32 0.015625, %v325_v26  ;;  %v362_v47 = vmul.f32 0.015625, %v316_v31 }
 0x206   :  { %v381_v49 = vadd.f32 1e-05, %v365_v46  ;;  %v378_v51 = vadd.f32 1e-05, %v362_v47 }
 0x207   :  { %v319_v53 = vpop.xlane.xlu1 %318 }
 0x208   :  { %1479 = vrsqrt.f32 %v381_v49  ;;  %v363_v54 = vmul.f32 0.015625, %v319_v53  ;;  %v334_v36 = vpop.xlane.xlu0 %333 }
 0x209   :  { %1481 = vrsqrt.f32 %v378_v51  ;;  %v368_v40 = vmul.f32 0.015625, %v334_v36 }
 0x20a   :  { %v379_v58 = vadd.f32 1e-05, %v363_v54 }
 0x20b   :  { %v384_v59 = vadd.f32 1e-05, %v368_v40  ;;  %v337_v60 = vpop.xlane.xlu1 %336 }
 0x20c   :  { %1483 = vrsqrt.f32 %v379_v58  ;;  %v369_v61 = vmul.f32 0.015625, %v337_v60  ;;  %v328_v62 = vpop.xlane.xlu0 %327 }
 0x20d   :  { %1485 = vrsqrt.f32 %v384_v59  ;;  %v366_v63 = vmul.f32 0.015625, %v328_v62 }
 0x20e   :  { %v1478_v0 = vpop.eup %1477  ;;  %v385_v43 = vadd.f32 1e-05, %v369_v61 }
 0x20f   :  { %v382_v3 = vadd.f32 1e-05, %v366_v63  ;;  %v331_v4 = vpop.xlane.xlu1 %330  ;;  %v412_v5 = vmul.f32 %v1478_v0, %v1688_v1 }
 0x210   :  { %1487 = vrsqrt.f32 %v385_v43  ;;  %v367_v6 = vmul.f32 0.015625, %v331_v4  ;;  %v346_v7 = vpop.xlane.xlu0 %345 }
 0x211   :  { %1489 = vrsqrt.f32 %v382_v3  ;;  %v372_v12 = vmul.f32 0.015625, %v346_v7  ;;  %v432_v18 = vmul.f32 %v1830_v9, %v412_v5 }
 0x212   :  { %v1480_v14 = vpop.eup %1479  ;;  %v383_v15 = vadd.f32 1e-05, %v367_v6 }
 0x213   :  { %v1482_v52 = vpop.eup %1481  ;;  %v413_v50 = vmul.f32 %v1480_v14, %v1696_v8  ;;  %v388_v17 = vadd.f32 1e-05, %v372_v12  ;;  %v349_v55 = vpop.xlane.xlu1 %348  ;;  %v452_v26 = vadd.f32 %v1839_v25, %v432_v18 }
 0x214   :  { %v410_v1 = vmul.f32 %v1482_v52, %v1691_v2  ;;  %1491 = vrsqrt.f32 %v383_v15  ;;  %v373_v16 = vmul.f32 0.015625, %v349_v55  ;;  %v340_v20 = vpop.xlane.xlu0 %339 }
 0x215   :  { %v433_v22 = vmul.f32 %v1830_v9, %v413_v50  ;;  %1493 = vrsqrt.f32 %v388_v17  ;;  %v370_v23 = vmul.f32 0.015625, %v340_v20  ;;  %v468_v60 = vmax.f32 %v452_v26, 0.0 }
 0x216   :  { %v1484_v27 = vpop.eup %1483  ;;  %v389_v8 = vadd.f32 1e-05, %v373_v16  ;;  %v430_v29 = vmul.f32 %v1830_v9, %v410_v1 }
 0x217   :  { %v1486_v30 = vpop.eup %1485  ;;  %v411_v32 = vmul.f32 %v1484_v27, %v1702_v11  ;;  %v386_v2 = vadd.f32 1e-05, %v370_v23  ;;  %v343_v33 = vpop.xlane.xlu1 %342  ;;  %v453_v34 = vadd.f32 %v1839_v25, %v433_v22 }
 0x218   :  { %v416_v39 = vmul.f32 %v1486_v30, %v1711_v21  ;;  %1495 = vrsqrt.f32 %v389_v8  ;;  %v371_v41 = vmul.f32 0.015625, %v343_v33  ;;  %v358_v42 = vpop.xlane.xlu0 %357  ;;  %v450_v47 = vadd.f32 %v1839_v25, %v430_v29 }
 0x219   :  { %1497 = vrsqrt.f32 %v386_v2  ;;  %v376_v31 = vmul.f32 0.015625, %v358_v42  ;;  %v431_v46 = vmul.f32 %v1830_v9, %v411_v32  ;;  %v469_v11 = vmax.f32 %v453_v34, 0.0 }
 0x21a   :  { %v1488_v49 = vpop.eup %1487  ;;  %v387_v51 = vadd.f32 1e-05, %v371_v41  ;;  %v436_v40 = vmul.f32 %v1830_v9, %v416_v39  ;;  %v466_v63 = vmax.f32 %v450_v47, 0.0 }
 0x21b   :  { %v1490_v53 = vpop.eup %1489  ;;  %v417_v54 = vmul.f32 %v1488_v49, %v1714_v19  ;;  %v392_v36 = vadd.f32 1e-05, %v376_v31  ;;  %v451_v21 = vadd.f32 %v1839_v25, %v431_v46  ;;  %v483_v4 = vpack.c.bf16 %v469_v11, %v468_v60 }
 0x21c   :  { %v414_v58 = vmul.f32 %v1490_v53, %v1722_v24  ;;  %1499 = vrsqrt.f32 %v387_v51  ;;  %v352_v59 = vpop.xlane.xlu1 %351  ;;  %v456_v14 = vadd.f32 %v1839_v25, %v436_v40 }
 0x21d   :  { %1501 = vrsqrt.f32 %v392_v36  ;;  %v374_v61 = vmul.f32 0.015625, %v352_v59  ;;  %v355_v62 = vpop.xlane.xlu0 %354  ;;  %v467_v0 = vmax.f32 %v451_v21, 0.0  ;;  %v437_v19 = vmul.f32 %v1830_v9, %v417_v54 }
 0x21e   :  { %v1492_v43 = vpop.eup %1491  ;;  %v375_v3 = vmul.f32 0.015625, %v355_v62  ;;  %v434_v5 = vmul.f32 %v1830_v9, %v414_v58  ;;  %v472_v30 = vmax.f32 %v456_v14, 0.0 }
 0x21f   :  { %v1494_v6 = vpop.eup %1493  ;;  %v415_v7 = vmul.f32 %v1492_v43, %v1726_v28  ;;  %v390_v24 = vadd.f32 1e-05, %v374_v61  ;;  %v482_v12 = vpack.c.bf16 %v467_v0, %v466_v63  ;;  %v457_v17 = vadd.f32 %v1839_v25, %v437_v19 }
 0x220   :  { %v420_v15 = vmul.f32 %v1494_v6, %v1734_v44  ;;  %v391_v52 = vadd.f32 1e-05, %v375_v3  ;;  %v361_v50 = vpop.xlane.xlu1 %360  ;;  %v454_v55 = vadd.f32 %v1839_v25, %v434_v5  ;;  %v567_v44 = vsel %vm216_vm2, %v483_v4, %v1824_v37 }
 0x221   :  { %1503 = vrsqrt.f32 %v390_v24  ;;  %v377_v18 = vmul.f32 0.015625, %v361_v50  ;;  %v564_v1 = vsel %vm216_vm2, %v482_v12, %v1822_v35  ;;  %v435_v16 = vmul.f32 %v1830_v9, %v415_v7  ;;  %v551_v41 = vpop.permute.xlu0 %550 }
 0x222   :  { %v1496_v28 = vpop.eup %1495  ;;  %1505 = vrsqrt.f32 %v391_v52  ;;  %1364 = vmatprep.mubr.msk.bf16.mxu1 %vm626_vm4, %v564_v1  ;;  %v473_v20 = vmax.f32 %v457_v17, 0.0  ;;  %v440_v32 = vmul.f32 %v1830_v9, %v420_v15  ;;  %v470_v2 = vmax.f32 %v454_v55, 0.0 }
 0x223   :  { %v1498_v22 = vpop.eup %1497  ;;  %v421_v23 = vmul.f32 %v1496_v28, %v1738_v45  ;;  %v393_v27 = vadd.f32 1e-05, %v377_v18  ;;  %1365 = vmatmul.mubr.msk.bf16.vlgmr.msra.gmra.mrb[16].mxu1 %vm626_vm4, %v567_v44  ;;  %v455_v8 = vadd.f32 %v1839_v25, %v435_v16 }
 0x224   :  { %v418_v35 = vmul.f32 %v1498_v22, %v1746_v56  ;;  %v553_v29 = vpop.permute.xlu1 %552  ;;  %v485_v39 = vpack.c.bf16 %v473_v20, %v472_v30  ;;  %v460_v46 = vadd.f32 %v1839_v25, %v440_v32 }
 0x225   :  { %1507 = vrsqrt.f32 %v393_v27  ;;  %v471_v33 = vmax.f32 %v455_v8, 0.0  ;;  %v441_v37 = vmul.f32 %v1830_v9, %v421_v23  ;;  %v559_v52 = vpop.permute.xlu0 %558 }
 0x226   :  { %v1500_v34 = vpop.eup %1499  ;;  %v438_v45 = vmul.f32 %v1830_v9, %v418_v35  ;;  %v573_v54 = vsel %vm216_vm2, %v485_v39, %v553_v29  ;;  %v476_v59 = vmax.f32 %v460_v46, 0.0 }
 0x227   :  { %v1502_v42 = vpop.eup %1501  ;;  %v419_v26 = vmul.f32 %v1500_v34, %v1750_v57  ;;  %v484_v31 = vpack.c.bf16 %v471_v33, %v470_v2  ;;  %v461_v56 = vadd.f32 %v1839_v25, %v441_v37 }
 0x228   :  { %v555_v49 = vpop.permute.xlu1 %554  ;;  %v458_v51 = vadd.f32 %v1839_v25, %v438_v45  ;;  %v424_v53 = vmul.f32 %v1502_v42, %v1758_v38 }
 0x229   :  { %v439_v47 = vmul.f32 %v1830_v9, %v419_v26  ;;  %v570_v11 = vsel %vm216_vm2, %v484_v31, %v551_v41  ;;  %v477_v36 = vmax.f32 %v461_v56, 0.0 }
 0x22a   :  { %1368 = vmatprep.mubr.msk.bf16.mxu1 %vm626_vm4, %v570_v11  ;;  %v474_v62 = vmax.f32 %v458_v51, 0.0  ;;  %v444_v0 = vmul.f32 %v1830_v9, %v424_v53 }
 0x22b   :  { %v1504_v57 = vpop.eup %1503  ;;  %v459_v21 = vadd.f32 %v1839_v25, %v439_v47  ;;  %1369 = vmatmul.mubr.msk.bf16.gmra.mrb[20].mxu1 %vm626_vm4, %v573_v54  ;;  %v487_v63 = vpack.c.bf16 %v477_v36, %v476_v59 }
 0x22c   :  { %v1506_v40 = vpop.eup %1505  ;;  %v422_v58 = vmul.f32 %v1504_v57, %v1768_v48  ;;  %v557_v4 = vpop.permute.xlu1 %556  ;;  %v464_v14 = vadd.f32 %v1839_v25, %v444_v0 }
 0x22d   :  { %v423_v60 = vmul.f32 %v1506_v40, %v1772_v13  ;;  %v475_v61 = vmax.f32 %v459_v21, 0.0  ;;  %v579_v7 = vsel %vm216_vm2, %v487_v63, %v557_v4 }
 0x22e   :  { %v442_v38 = vmul.f32 %v1830_v9, %v422_v58  ;;  %v480_v55 = vmax.f32 %v464_v14, 0.0 }
 0x22f   :  { %v1508_v43 = vpop.eup %1507  ;;  %v486_v3 = vpack.c.bf16 %v475_v61, %v474_v62  ;;  %v443_v19 = vmul.f32 %v1830_v9, %v423_v60 }
 0x230   :  { %v425_v5 = vmul.f32 %v1508_v43, %v1765_v10  ;;  %v462_v6 = vadd.f32 %v1839_v25, %v442_v38  ;;  %v561_v1 = vpop.permute.xlu1 %560 }
 0x231   :  { %v576_v48 = vsel %vm216_vm2, %v486_v3, %v555_v49  ;;  %v463_v13 = vadd.f32 %v1839_v25, %v443_v19 }
 0x232   :  { %1372 = vmatprep.mubr.msk.bf16.mxu1 %vm626_vm4, %v576_v48  ;;  %v478_v24 = vmax.f32 %v462_v6, 0.0  ;;  %v445_v12 = vmul.f32 %v1830_v9, %v425_v5  ;;  %v1264_v9 = vld [vmem:[%s2219_s4 + $0x3] ss:$0 sm:$0xff] }
 0x233   :  { %1373 = vmatmul.mubr.msk.bf16.gmra.mrb[24].mxu1 %vm626_vm4, %v579_v7  ;;  %v479_v15 = vmax.f32 %v463_v13, 0.0 }
 0x234   :  { %v465_v10 = vadd.f32 %v1839_v25, %v445_v12 }
 0x235   :  { %v488_v50 = vpack.c.bf16 %v479_v15, %v478_v24 }
 0x236   :  { %v481_v17 = vmax.f32 %v465_v10, 0.0 }
 0x237   :  { %v582_v18 = vsel %vm216_vm2, %v488_v50, %v559_v52 }
 0x238   :  { %1376 = vmatprep.mubr.msk.bf16.mxu1 %vm626_vm4, %v582_v18  ;;  %v489_v16 = vpack.c.bf16 %v481_v17, %v480_v55 }
 0x23a   :  { %v585_v28 = vsel %vm216_vm2, %v489_v16, %v561_v1 }
 0x23b   :  { %1377 = vmatmul.mubr.msk.bf16.gmra.mrb[28].mxu1 %vm626_vm4, %v585_v28 }
 0x2f6   :  { %v1366_v44 = vpop.f32.mrb[16].mxu1 }
 0x2f7   :  { %v1905_v25 = vadd.f32 %v1366_v44, %v1264_v9  ;;  %v681_v20 = vpop.f32.mrb[17].mxu1 }
 0x2f8   :  { %v1367_v22 = vpop.f32.mrb[18].mxu1  ;;  %v1907_v23 = vadd.f32 %v1264_v9, %v681_v20 }
 0x2f9   :  { %v684_v27 = vpop.f32.mrb[19].mxu1  ;;  %v751_v8 = vsel %vm744_vm5, %v1905_v25, 0.0  ;;  %v1925_v31 = vadd.f32 %v1367_v22, %v1264_v9  ;;  %v996_v61 = vmax.f32 %v1905_v25, 0.0 }
 0x2fa   :  { %v1911_v35 = vadd.f32 %v1264_v9, %v684_v27  ;;  %752 = vadd.xlane.f32.xlu0 %v751_v8  ;;  %v745_v30 = vsel %vm744_vm5, %v1907_v23, 0.0  ;;  %v994_v43 = vmax.f32 %v1907_v23, 0.0 }
 0x2fb   :  { %v997_v11 = vmax.f32 %v1925_v31, 0.0  ;;  %v754_v63 = vsel %vm744_vm5, %v1925_v31, 0.0 }
 0x2fc   :  { %v748_v29 = vsel %vm744_vm5, %v1911_v35, 0.0  ;;  %v995_v40 = vmax.f32 %v1911_v35, 0.0 }
 0x2fd   :  { %749 = vadd.xlane.f32.xlu1 %v748_v29 }
 0x2fe   :  { %746 = vadd.xlane.f32.xlu0 %v745_v30  ;;  %v1370_v32 = vpop.f32.mrb[20].mxu1 }
 0x2ff   :  { %v1917_v2 = vadd.f32 %v1370_v32, %v1264_v9  ;;  %v697_v33 = vpop.f32.mrb[21].mxu1 }
 0x300   :  { %v1919_v37 = vadd.f32 %v1264_v9, %v697_v33  ;;  %v1371_v34 = vpop.f32.mrb[22].mxu1 }
 0x301   :  { %v700_v39 = vpop.f32.mrb[23].mxu1  ;;  %v1947_v62 = vadd.f32 %v1371_v34, %v1264_v9  ;;  %v763_v4 = vsel %vm744_vm5, %v1917_v2, 0.0 }
 0x302   :  { %v1921_v45 = vadd.f32 %v1264_v9, %v700_v39  ;;  %v757_v19 = vsel %vm744_vm5, %v1919_v37, 0.0  ;;  %v998_v12 = vmax.f32 %v1919_v37, 0.0  ;;  %v1543_v39 = vmov 0.0|0.0  }
 0x303   :  { %v766_v38 = vsel %vm744_vm5, %v1947_v62, 0.0  ;;  %v1001_v34 = vmax.f32 %v1947_v62, 0.0  ;;  %1415 = vmatprep.subr.bf16.mxu0 %v1543_v39 }
 0x304   :  { %v760_v0 = vsel %vm744_vm5, %v1921_v45, 0.0  ;;  %v999_v3 = vmax.f32 %v1921_v45, 0.0 }
 0x306   :  { %v1374_v41 = vpop.f32.mrb[24].mxu1 }
 0x307   :  { %v1923_v42 = vadd.f32 %v1374_v41, %v1264_v9  ;;  %v713_v26 = vpop.f32.mrb[25].mxu1 }
 0x308   :  { %v1927_v56 = vadd.f32 %v1264_v9, %v713_v26  ;;  %v1375_v46 = vpop.f32.mrb[26].mxu1 }
 0x309   :  { %v1929_v47 = vadd.f32 %v1375_v46, %v1264_v9  ;;  %v716_v49 = vpop.f32.mrb[27].mxu1  ;;  %v775_v6 = vsel %vm744_vm5, %v1923_v42, 0.0 }
 0x30a   :  { %v1931_v51 = vadd.f32 %v1264_v9, %v716_v49  ;;  %v769_v13 = vsel %vm744_vm5, %v1927_v56, 0.0 }
 0x30b   :  { %v778_v5 = vsel %vm744_vm5, %v1929_v47, 0.0 }
 0x30c   :  { %v772_v48 = vsel %vm744_vm5, %v1931_v51, 0.0 }
 0x30e   :  { %1032 = vrot.lane.b32.xlu1 %v997_v11, %s1542_s15  ;;  %v1378_v53 = vpop.f32.mrb[28].mxu1 }
 0x30f   :  { %v1935_v54 = vadd.f32 %v1378_v53, %v1264_v9  ;;  %v729_v36 = vpop.f32.mrb[29].mxu1 }
 0x310   :  { %v1937_v57 = vadd.f32 %v1264_v9, %v729_v36  ;;  %v1379_v21 = vpop.f32.mrb[30].mxu1 }
 0x311   :  { %v1940_v58 = vadd.f32 %v1379_v21, %v1264_v9  ;;  %v732_v59 = vpop.f32.mrb[31].mxu1  ;;  %v787_v17 = vsel %vm744_vm5, %v1935_v54, 0.0 }
 0x312   :  { %v1942_v60 = vadd.f32 %v1264_v9, %v732_v59  ;;  %1028 = vrot.lane.b32.xlu1 %v995_v40, %s1542_s15  ;;  %v781_v18 = vsel %vm744_vm5, %v1937_v57, 0.0 }
 0x313   :  { %v790_v7 = vsel %vm744_vm5, %v1940_v58, 0.0 }
 0x314   :  { %1030 = vrot.lane.b32.xlu0 %v996_v61, %s1542_s15  ;;  %v784_v24 = vsel %vm744_vm5, %v1942_v60, 0.0 }
 0x333   :  { %755 = vadd.xlane.f32.xlu0 %v754_v63 }
 0x336   :  { %767 = vadd.xlane.f32.xlu1 %v766_v38 }
 0x33a   :  { %761 = vadd.xlane.f32.xlu1 %v760_v0 }
 0x349   :  { %1026 = vrot.lane.b32.xlu0 %v994_v43, %s1542_s15 }
 0x34b   :  { %1036 = vrot.lane.b32.xlu1 %v999_v3, %s1542_s15 }
 0x368   :  { %764 = vadd.xlane.f32.xlu0 %v763_v4 }
 0x36c   :  { %758 = vadd.xlane.f32.xlu0 %v757_v19 }
 0x36f   :  { %779 = vadd.xlane.f32.xlu1 %v778_v5 }
 0x370   :  { %776 = vadd.xlane.f32.xlu0 %v775_v6 }
 0x373   :  { %773 = vadd.xlane.f32.xlu1 %v772_v48  ;;  %v1000_v48 = vmax.f32 %v1917_v2, 0.0 }
 0x374   :  { %770 = vadd.xlane.f32.xlu0 %v769_v13 }
 0x377   :  { %791 = vadd.xlane.f32.xlu1 %v790_v7 }
 0x37b   :  { %785 = vadd.xlane.f32.xlu1 %v784_v24 }
 0x387   :  { %v753_v14 = vpop.xlane.xlu0 %752 }
 0x388   :  { %v796_v15 = vmul.f32 0.03125, %v753_v14 }
 0x38a   :  { %1034 = vrot.lane.b32.xlu0 %v998_v12, %s1542_s15  ;;  %v1978_v10 = vsub.f32 %v1905_v25, %v796_v15  ;;  %v750_v44 = vpop.xlane.xlu1 %749 }
 0x38b   :  { %v747_v52 = vpop.xlane.xlu0 %746  ;;  %v795_v20 = vmul.f32 0.03125, %v750_v44 }
 0x38c   :  { %v794_v50 = vmul.f32 0.03125, %v747_v52  ;;  %v828_v1 = vmul.f32 %v1978_v10, %v1978_v10 }
 0x38d   :  { %v1996_v27 = vsub.f32 %v1911_v35, %v795_v20  ;;  %v1002_v35 = vmax.f32 %v1927_v56, 0.0 }
 0x38e   :  { %v1983_v55 = vsub.f32 %v1907_v23, %v794_v50  ;;  %v848_v16 = vsel %vm744_vm5, %v828_v1, 0.0  ;;  %v2012_v41 = vpop.permute.xlu1 %1032 }
 0x38f   :  { %v1993_v25 = vpop.permute.xlu0 %1030  ;;  %v827_v32 = vmul.f32 %v1996_v27, %v1996_v27 }
 0x390   :  { %v826_v28 = vmul.f32 %v1983_v55, %v1983_v55 }
 0x391   :  { %v845_v33 = vsel %vm744_vm5, %v827_v32, 0.0 }
 0x392   :  { %v842_v9 = vsel %vm744_vm5, %v826_v28, 0.0  ;;  %v2014_v26 = vpop.permute.xlu1 %1028 }
 0x3a9   :  { %788 = vadd.xlane.f32.xlu0 %v787_v17 }
 0x3ad   :  { %782 = vadd.xlane.f32.xlu0 %v781_v18 }
 0x3b1   :  { %849 = vadd.xlane.f32.xlu0 %v848_v16 }
 0x3b5   :  { %843 = vadd.xlane.f32.xlu0 %v842_v9 }
 0x3c0   :  { %v756_v22 = vpop.xlane.xlu0 %755 }
 0x3c1   :  { %v797_v23 = vmul.f32 0.03125, %v756_v22 }
 0x3c3   :  { %v1999_v8 = vsub.f32 %v1925_v31, %v797_v23  ;;  %v768_v46 = vpop.xlane.xlu1 %767 }
 0x3c4   :  { %v2016_v31 = vpop.permute.xlu0 %1026  ;;  %v801_v53 = vmul.f32 0.03125, %v768_v46 }
 0x3c5   :  { %v829_v29 = vmul.f32 %v1999_v8, %v1999_v8 }
 0x3c6   :  { %v2024_v63 = vsub.f32 %v1947_v62, %v801_v53 }
 0x3c7   :  { %v851_v30 = vsel %vm744_vm5, %v829_v29, 0.0  ;;  %v762_v21 = vpop.xlane.xlu1 %761 }
 0x3c8   :  { %852 = vadd.xlane.f32.xlu1 %v851_v30  ;;  %v799_v38 = vmul.f32 0.03125, %v762_v21  ;;  %v833_v5 = vmul.f32 %v2024_v63, %v2024_v63 }
 0x3ca   :  { %v2033_v4 = vsub.f32 %v1921_v45, %v799_v38  ;;  %v863_v62 = vsel %vm744_vm5, %v833_v5, 0.0  ;;  %v1003_v45 = vmax.f32 %v1931_v51, 0.0 }
 0x3cb   :  { %v2046_v13 = vpop.permute.xlu1 %1036 }
 0x3cc   :  { %846 = vadd.xlane.f32.xlu1 %v845_v33 }
 0x3dd   :  { %1040 = vrot.lane.b32.xlu1 %v1001_v34, %s1542_s15 }
 0x3e1   :  { %1042 = vrot.lane.b32.xlu1 %v1002_v35, %s1542_s15 }
 0x3f5   :  { %v765_v49 = vpop.xlane.xlu0 %764 }
 0x3f6   :  { %v800_v11 = vmul.f32 0.03125, %v765_v49 }
 0x3f8   :  { %v2019_v36 = vsub.f32 %v1917_v2, %v800_v11 }
 0x3f9   :  { %v759_v40 = vpop.xlane.xlu0 %758 }
 0x3fa   :  { %v798_v59 = vmul.f32 0.03125, %v759_v40  ;;  %v832_v61 = vmul.f32 %v2019_v36, %v2019_v36 }
 0x3fc   :  { %v2027_v0 = vsub.f32 %v1919_v37, %v798_v59  ;;  %v860_v43 = vsel %vm744_vm5, %v832_v61, 0.0  ;;  %v831_v37 = vmul.f32 %v2033_v4, %v2033_v4  ;;  %v780_v7 = vpop.xlane.xlu1 %779 }
 0x3fd   :  { %861 = vadd.xlane.f32.xlu0 %v860_v43  ;;  %v777_v24 = vpop.xlane.xlu0 %776  ;;  %v805_v50 = vmul.f32 0.03125, %v780_v7 }
 0x3fe   :  { %v830_v3 = vmul.f32 %v2027_v0, %v2027_v0  ;;  %v857_v6 = vsel %vm744_vm5, %v831_v37, 0.0  ;;  %v804_v18 = vmul.f32 0.03125, %v777_v24 }
 0x3ff   :  { %v2052_v2 = vsub.f32 %v1929_v47, %v805_v50 }
 0x400   :  { %v854_v19 = vsel %vm744_vm5, %v830_v3, 0.0  ;;  %v774_v12 = vpop.xlane.xlu1 %773  ;;  %v2059_v44 = vsub.f32 %v1923_v42, %v804_v18 }
 0x401   :  { %855 = vadd.xlane.f32.xlu0 %v854_v19  ;;  %v771_v14 = vpop.xlane.xlu0 %770  ;;  %v803_v20 = vmul.f32 0.03125, %v774_v12  ;;  %v837_v29 = vmul.f32 %v2052_v2, %v2052_v2 }
 0x402   :  { %v802_v15 = vmul.f32 0.03125, %v771_v14  ;;  %v836_v33 = vmul.f32 %v2059_v44, %v2059_v44 }
 0x403   :  { %v2068_v32 = vsub.f32 %v1931_v51, %v803_v20  ;;  %v875_v46 = vsel %vm744_vm5, %v837_v29, 0.0 }
 0x404   :  { %v792_v52 = vpop.xlane.xlu1 %791  ;;  %v2049_v17 = vsub.f32 %v1927_v56, %v802_v15  ;;  %v872_v53 = vsel %vm744_vm5, %v836_v33, 0.0  ;;  %v1004_v15 = vmax.f32 %v1923_v42, 0.0 }
 0x405   :  { %864 = vadd.xlane.f32.xlu1 %v863_v62  ;;  %v809_v1 = vmul.f32 0.03125, %v792_v52  ;;  %v2056_v28 = vpop.permute.xlu0 %1034  ;;  %v835_v51 = vmul.f32 %v2068_v32, %v2068_v32 }
 0x406   :  { %v834_v16 = vmul.f32 %v2049_v17, %v2049_v17 }
 0x407   :  { %v2062_v22 = vsub.f32 %v1940_v58, %v809_v1  ;;  %v869_v43 = vsel %vm744_vm5, %v835_v51, 0.0  ;;  %v1005_v1 = vmax.f32 %v1929_v47, 0.0  ;;  %v1009_v47 = vmax.f32 %v1940_v58, 0.0  ;;  %v2121_v58 = vld [vmem:[%s2219_s4 + $0x5] ss:$0 sm:$0xff] }
 0x408   :  { %v786_v9 = vpop.xlane.xlu1 %785  ;;  %v866_v23 = vsel %vm744_vm5, %v834_v16, 0.0 }
 0x409   :  { %858 = vadd.xlane.f32.xlu1 %v857_v6  ;;  %v807_v56 = vmul.f32 0.03125, %v786_v9  ;;  %v841_v49 = vmul.f32 %v2062_v22, %v2062_v22  ;;  %v1006_v9 = vmax.f32 %v1937_v57, 0.0 }
 0x40b   :  { %v2073_v34 = vsub.f32 %v1942_v60, %v807_v56  ;;  %v887_v59 = vsel %vm744_vm5, %v841_v49, 0.0  ;;  %v1007_v56 = vmax.f32 %v1942_v60, 0.0 }
 0x40d   :  { %v839_v61 = vmul.f32 %v2073_v34, %v2073_v34 }
 0x40f   :  { %v881_v3 = vsel %vm744_vm5, %v839_v61, 0.0 }
 0x417   :  { %1038 = vrot.lane.b32.xlu0 %v1000_v48, %s1542_s15 }
 0x41a   :  { %1044 = vrot.lane.b32.xlu1 %v1003_v45, %s1542_s15 }
 0x436   :  { %867 = vadd.xlane.f32.xlu0 %v866_v23  ;;  %v789_v30 = vpop.xlane.xlu0 %788  ;;  %v1008_v23 = vmax.f32 %v1935_v54, 0.0 }
 0x437   :  { %v808_v35 = vmul.f32 0.03125, %v789_v30  ;;  %v2114_v30 = vld [vmem:[%s2219_s4 + $0x4] ss:$0 sm:$0xff] }
 0x439   :  { %v2082_v21 = vsub.f32 %v1935_v54, %v808_v35 }
 0x43a   :  { %876 = vadd.xlane.f32.xlu0 %v875_v46  ;;  %v783_v11 = vpop.xlane.xlu0 %782 }
 0x43b   :  { %v806_v40 = vmul.f32 0.03125, %v783_v11  ;;  %v840_v19 = vmul.f32 %v2082_v21, %v2082_v21 }
 0x43d   :  { %v2088_v38 = vsub.f32 %v1937_v57, %v806_v40  ;;  %v884_v62 = vsel %vm744_vm5, %v840_v19, 0.0 }
 0x43e   :  { %873 = vadd.xlane.f32.xlu1 %v872_v53  ;;  %888 = vadd.xlane.f32.xlu0 %v887_v59  ;;  %v850_v5 = vpop.xlane.xlu0 %849 }
 0x43f   :  { %v838_v37 = vmul.f32 %v2088_v38, %v2088_v38  ;;  %v892_v24 = vmul.f32 0.03125, %v850_v5 }
 0x441   :  { %v878_v48 = vsel %vm744_vm5, %v838_v37, 0.0  ;;  %v908_v52 = vadd.f32 1e-05, %v892_v24 }
 0x442   :  { %870 = vadd.xlane.f32.xlu1 %v869_v43  ;;  %882 = vadd.xlane.f32.xlu0 %v881_v3  ;;  %v844_v6 = vpop.xlane.xlu0 %843 }
 0x443   :  { %v890_v45 = vmul.f32 0.03125, %v844_v6  ;;  %v1545_v6 = vmov 0.0  }
 0x444   :  { %1412 = vmatprep.mubr.msk.f32.mxu0 %vm1544_vm7, %v1545_v6 }
 0x445   :  { %v906_v7 = vadd.f32 1e-05, %v890_v45  ;;  %v28_v45 = vld [vmem:[%s2219_s4 + $0x7] sm:$0x1] }
 0x446   :  { %885 = vadd.xlane.f32.xlu1 %v884_v62 }
 0x447   :  { %1509 = vrsqrt.f32 %v906_v7 }
 0x44a   :  { %879 = vadd.xlane.f32.xlu1 %v878_v48 }
 0x451   :  { %v1510_v42 = vpop.eup %1509 }
 0x452   :  { %v938_v57 = vmul.f32 %v1510_v42, %v1983_v55 }
 0x454   :  { %v958_v60 = vmul.f32 %v2114_v30, %v938_v57 }
 0x455   :  { %v853_v12 = vpop.xlane.xlu1 %852 }
 0x456   :  { %v893_v14 = vmul.f32 0.03125, %v853_v12  ;;  %v978_v49 = vadd.f32 %v2121_v58, %v958_v60 }
 0x458   :  { %v909_v50 = vadd.f32 1e-05, %v893_v14  ;;  %1046 = vrot.lane.b32.xlu0 %v1004_v15, %s1542_s15 }
 0x459   :  { %v847_v18 = vpop.xlane.xlu1 %846 }
 0x45a   :  { %1511 = vrsqrt.f32 %v909_v50  ;;  %v891_v16 = vmul.f32 0.03125, %v847_v18 }
 0x45b   :  { %1048 = vrot.lane.b32.xlu1 %v1005_v1, %s1542_s15  ;;  %1513 = vrsqrt.f32 %v908_v52 }
 0x45c   :  { %v907_v20 = vadd.f32 1e-05, %v891_v16  ;;  %1050 = vrot.lane.b32.xlu0 %v1006_v9, %s1542_s15 }
 0x45d   :  { %v1041_v48 = vpop.permute.xlu1 %1040 }
 0x45e   :  { %1515 = vrsqrt.f32 %v907_v20 }
 0x45f   :  { %1052 = vrot.lane.b32.xlu1 %v1007_v56, %s1542_s15 }
 0x460   :  { %1054 = vrot.lane.b32.xlu0 %v1008_v23, %s1542_s15 }
 0x461   :  { %v2151_v7 = vpop.permute.xlu1 %1042 }
 0x463   :  { %1056 = vrot.lane.b32.xlu1 %v1009_v47, %s1542_s15 }
 0x464   :  { %v1512_v29 = vpop.eup %1511 }
 0x465   :  { %v1514_v33 = vpop.eup %1513  ;;  %v941_v54 = vmul.f32 %v1512_v29, %v1999_v8  ;;  %v1074_v8 = vadd.f32 %v2016_v31, %v978_v49 }
 0x466   :  { %v940_v55 = vmul.f32 %v1514_v33, %v1978_v10 }
 0x467   :  { %v961_v53 = vmul.f32 %v2114_v30, %v941_v54  ;;  %v1090_v43 = vmax.f32 %v1074_v8, 0.0 }
 0x468   :  { %v1516_v35 = vpop.eup %1515  ;;  %v960_v40 = vmul.f32 %v2114_v30, %v940_v55 }
 0x469   :  { %v939_v46 = vmul.f32 %v1516_v35, %v1996_v27  ;;  %v981_v61 = vadd.f32 %v2121_v58, %v961_v53 }
 0x46a   :  { %v980_v27 = vadd.f32 %v2121_v58, %v960_v40 }
 0x46b   :  { %v959_v11 = vmul.f32 %v2114_v30, %v939_v46  ;;  %v1077_v5 = vadd.f32 %v2012_v41, %v981_v61 }
 0x46d   :  { %v979_v51 = vadd.f32 %v2121_v58, %v959_v11  ;;  %v1093_v31 = vmax.f32 %v1077_v5, 0.0 }
 0x46f   :  { %v1075_v59 = vadd.f32 %v2014_v26, %v979_v51  ;;  %v1076_v26 = vadd.f32 %v1993_v25, %v980_v27  ;;  %v1546_v25 = vmov 0  }
 0x470   :  { %1455 = vset.pattern.permute.xlu0 %v1546_v25 }
 0x471   :  { %v1091_v10 = vmax.f32 %v1075_v59, 0.0  ;;  %v1092_v62 = vmax.f32 %v1076_v26, 0.0  ;;  %1108 = vperm.xlu0 %1455, %v28_v45  }
 0x473   :  { %v1416_v19 = vpack.c.bf16 %v1091_v10, %v1090_v43  ;;  %v1420_v37 = vpack.c.bf16 %v1093_v31, %v1092_v62 }
 0x475   :  { %1418 = vmatpush3.bf16.xpose.msk.msra.mxu0 %vm2136_vm6, %v1416_v19 }
 0x476   :  { %1419 = vmatprep.subr.bf16.mxu0 %v1543_v39 }
 0x47d   :  { %1422 = vmatpush3.bf16.xpose.msk.msra.mxu0 %vm2136_vm6, %v1420_v37 }
 0x47e   :  { %1423 = vmatprep.subr.bf16.mxu0 %v1543_v39 }
 0x48a   :  { %v862_v41 = vpop.xlane.xlu0 %861 }
 0x48b   :  { %v896_v14 = vmul.f32 0.03125, %v862_v41 }
 0x48d   :  { %v912_v18 = vadd.f32 1e-05, %v896_v14 }
 0x48e   :  { %v856_v24 = vpop.xlane.xlu0 %855 }
 0x48f   :  { %v894_v12 = vmul.f32 0.03125, %v856_v24 }
 0x491   :  { %v910_v15 = vadd.f32 1e-05, %v894_v12 }
 0x492   :  { %v865_v52 = vpop.xlane.xlu1 %864  ;;  %v1039_v59 = vpop.permute.xlu0 %1038 }
 0x493   :  { %1517 = vrsqrt.f32 %v910_v15  ;;  %v897_v50 = vmul.f32 0.03125, %v865_v52 }
 0x495   :  { %v913_v1 = vadd.f32 1e-05, %v897_v50 }
 0x496   :  { %v859_v16 = vpop.xlane.xlu1 %858 }
 0x497   :  { %1519 = vrsqrt.f32 %v913_v1  ;;  %v895_v9 = vmul.f32 0.03125, %v859_v16 }
 0x498   :  { %1521 = vrsqrt.f32 %v912_v18 }
 0x499   :  { %v911_v20 = vadd.f32 1e-05, %v895_v9 }
 0x49a   :  { %v1045_v5 = vpop.permute.xlu1 %1044 }
 0x49b   :  { %1523 = vrsqrt.f32 %v911_v20 }
 0x49d   :  { %v1518_v56 = vpop.eup %1517 }
 0x49e   :  { %v942_v42 = vmul.f32 %v1518_v56, %v2027_v0 }
 0x4a0   :  { %v962_v47 = vmul.f32 %v2114_v30, %v942_v42 }
 0x4a1   :  { %v1520_v23 = vpop.eup %1519 }
 0x4a2   :  { %v1522_v57 = vpop.eup %1521  ;;  %v945_v29 = vmul.f32 %v1520_v23, %v2024_v63  ;;  %v982_v35 = vadd.f32 %v2121_v58, %v962_v47 }
 0x4a3   :  { %v944_v33 = vmul.f32 %v1522_v57, %v2019_v36 }
 0x4a4   :  { %v965_v55 = vmul.f32 %v2114_v30, %v945_v29  ;;  %v1078_v11 = vadd.f32 %v2056_v28, %v982_v35 }
 0x4a5   :  { %v1524_v60 = vpop.eup %1523  ;;  %v964_v49 = vmul.f32 %v2114_v30, %v944_v33 }
 0x4a6   :  { %v943_v54 = vmul.f32 %v1524_v60, %v2033_v4  ;;  %v985_v53 = vadd.f32 %v2121_v58, %v965_v55  ;;  %v1094_v51 = vmax.f32 %v1078_v11, 0.0 }
 0x4a7   :  { %v984_v36 = vadd.f32 %v2121_v58, %v964_v49 }
 0x4a8   :  { %v963_v46 = vmul.f32 %v2114_v30, %v943_v54  ;;  %v1081_v8 = vadd.f32 %v1041_v48, %v985_v53 }
 0x4a9   :  { %v1080_v61 = vadd.f32 %v1039_v59, %v984_v36 }
 0x4aa   :  { %v983_v0 = vadd.f32 %v2121_v58, %v963_v46  ;;  %v1097_v43 = vmax.f32 %v1081_v8, 0.0 }
 0x4ab   :  { %v1096_v10 = vmax.f32 %v1080_v61, 0.0 }
 0x4ac   :  { %v1079_v63 = vadd.f32 %v2046_v13, %v983_v0 }
 0x4ad   :  { %v1428_v28 = vpack.c.bf16 %v1097_v43, %v1096_v10 }
 0x4ae   :  { %v1095_v4 = vmax.f32 %v1079_v63, 0.0 }
 0x4b0   :  { %v1424_v40 = vpack.c.bf16 %v1095_v4, %v1094_v51 }
 0x4b2   :  { %1426 = vmatpush3.bf16.xpose.msk.msra.mxu0 %vm2136_vm6, %v1424_v40 }
 0x4b3   :  { %1427 = vmatprep.subr.bf16.mxu0 %v1543_v39 }
 0x4ba   :  { %1430 = vmatpush3.bf16.xpose.msk.msra.mxu0 %vm2136_vm6, %v1428_v28 }
 0x4bb   :  { %1431 = vmatprep.subr.bf16.mxu0 %v1543_v39 }
 0x4c3   :  { %v868_v13 = vpop.xlane.xlu0 %867 }
 0x4c4   :  { %v898_v27 = vmul.f32 0.03125, %v868_v13 }
 0x4c6   :  { %v914_v19 = vadd.f32 1e-05, %v898_v27 }
 0x4c7   :  { %v877_v26 = vpop.xlane.xlu0 %876 }
 0x4c8   :  { %v901_v31 = vmul.f32 0.03125, %v877_v26  ;;  %1525 = vrsqrt.f32 %v914_v19 }
 0x4ca   :  { %v917_v48 = vadd.f32 1e-05, %v901_v31 }
 0x4cb   :  { %v874_v62 = vpop.xlane.xlu1 %873  ;;  %v889_v37 = vpop.xlane.xlu0 %888 }
 0x4cc   :  { %v900_v6 = vmul.f32 0.03125, %v874_v62  ;;  %v905_v47 = vmul.f32 0.03125, %v889_v37 }
 0x4ce   :  { %v916_v41 = vadd.f32 1e-05, %v900_v6  ;;  %v921_v35 = vadd.f32 1e-05, %v905_v47 }
 0x4cf   :  { %v871_v45 = vpop.xlane.xlu1 %870  ;;  %v883_v25 = vpop.xlane.xlu0 %882 }
 0x4d0   :  { %1527 = vrsqrt.f32 %v916_v41  ;;  %v899_v24 = vmul.f32 0.03125, %v871_v45  ;;  %v903_v14 = vmul.f32 0.03125, %v883_v25 }
 0x4d1   :  { %1529 = vrsqrt.f32 %v917_v48 }
 0x4d2   :  { %v915_v12 = vadd.f32 1e-05, %v899_v24  ;;  %v1526_v52 = vpop.eup %1525  ;;  %v919_v50 = vadd.f32 1e-05, %v903_v14 }
 0x4d3   :  { %v886_v15 = vpop.xlane.xlu1 %885  ;;  %v946_v18 = vmul.f32 %v1526_v52, %v2049_v17  ;;  %v1047_v40 = vpop.permute.xlu0 %1046 }
 0x4d4   :  { %1531 = vrsqrt.f32 %v915_v12  ;;  %v904_v16 = vmul.f32 0.03125, %v886_v15 }
 0x4d5   :  { %1533 = vrsqrt.f32 %v919_v50  ;;  %v966_v23 = vmul.f32 %v2114_v30, %v946_v18 }
 0x4d6   :  { %v920_v57 = vadd.f32 1e-05, %v904_v16 }
 0x4d7   :  { %v880_v1 = vpop.xlane.xlu1 %879  ;;  %v986_v17 = vadd.f32 %v2121_v58, %v966_v23  ;;  %v1051_v31 = vpop.permute.xlu0 %1050 }
 0x4d8   :  { %v902_v9 = vmul.f32 0.03125, %v880_v1 }
 0x4d9   :  { %v1082_v11 = vadd.f32 %v2151_v7, %v986_v17 }
 0x4da   :  { %v1528_v20 = vpop.eup %1527  ;;  %v918_v56 = vadd.f32 1e-05, %v902_v9 }
 0x4db   :  { %v1530_v42 = vpop.eup %1529  ;;  %v948_v29 = vmul.f32 %v1528_v20, %v2059_v44  ;;  %v1098_v4 = vmax.f32 %v1082_v11, 0.0  ;;  %v1049_v59 = vpop.permute.xlu1 %1048 }
 0x4dc   :  { %1535 = vrsqrt.f32 %v918_v56  ;;  %v949_v33 = vmul.f32 %v1530_v42, %v2052_v2  ;;  %v1055_v14 = vpop.permute.xlu0 %1054 }
 0x4dd   :  { %1537 = vrsqrt.f32 %v920_v57  ;;  %v968_v55 = vmul.f32 %v2114_v30, %v948_v29 }
 0x4de   :  { %v1532_v60 = vpop.eup %1531  ;;  %v969_v49 = vmul.f32 %v2114_v30, %v949_v33  ;;  %1539 = vrsqrt.f32 %v921_v35 }
 0x4df   :  { %v947_v54 = vmul.f32 %v1532_v60, %v2068_v32  ;;  %v1534_v44 = vpop.eup %1533  ;;  %v988_v2 = vadd.f32 %v2121_v58, %v968_v55  ;;  %v1053_v41 = vpop.permute.xlu1 %1052 }
 0x4e0   :  { %v989_v63 = vadd.f32 %v2121_v58, %v969_v49  ;;  %v951_v51 = vmul.f32 %v1534_v44, %v2073_v34 }
 0x4e1   :  { %v967_v46 = vmul.f32 %v2114_v30, %v947_v54  ;;  %v1084_v61 = vadd.f32 %v1047_v40, %v988_v2 }
 0x4e2   :  { %v1085_v28 = vadd.f32 %v1049_v59, %v989_v63  ;;  %v971_v13 = vmul.f32 %v2114_v30, %v951_v51 }
 0x4e3   :  { %v987_v0 = vadd.f32 %v2121_v58, %v967_v46  ;;  %v1057_v15 = vpop.permute.xlu1 %1056 }
 0x4e4   :  { %v991_v26 = vadd.f32 %v2121_v58, %v971_v13 }
 0x4e5   :  { %v1083_v53 = vadd.f32 %v1045_v5, %v987_v0  ;;  %v1101_v5 = vmax.f32 %v1085_v28, 0.0 }
 0x4e6   :  { %v1536_v32 = vpop.eup %1535  ;;  %v1087_v45 = vadd.f32 %v1053_v41, %v991_v26 }
 0x4e7   :  { %v950_v36 = vmul.f32 %v1536_v32, %v2088_v38  ;;  %v1099_v8 = vmax.f32 %v1083_v53, 0.0  ;;  %v1538_v10 = vpop.eup %1537  ;;  %v1100_v38 = vmax.f32 %v1084_v61, 0.0 }
 0x4e8   :  { %v952_v27 = vmul.f32 %v1538_v10, %v2082_v21  ;;  %v1540_v19 = vpop.eup %1539  ;;  %v1103_v12 = vmax.f32 %v1087_v45, 0.0 }
 0x4e9   :  { %v970_v43 = vmul.f32 %v2114_v30, %v950_v36  ;;  %v1432_v7 = vpack.c.bf16 %v1099_v8, %v1098_v4  ;;  %v1436_v37 = vpack.c.bf16 %v1101_v5, %v1100_v38  ;;  %v953_v48 = vmul.f32 %v1540_v19, %v2062_v22 }
 0x4ea   :  { %v972_v6 = vmul.f32 %v2114_v30, %v952_v27 }
 0x4eb   :  { %1434 = vmatpush3.bf16.xpose.msk.msra.mxu0 %vm2136_vm6, %v1432_v7  ;;  %v990_v34 = vadd.f32 %v2121_v58, %v970_v43  ;;  %v973_v24 = vmul.f32 %v2114_v30, %v953_v48  ;;  %v27_v30 = vld [vmem:[%s2219_s4 + $0x6] sm:$0x1] }
 0x4ec   :  { %1435 = vmatprep.subr.bf16.mxu0 %v1543_v39  ;;  %v992_v21 = vadd.f32 %v2121_v58, %v972_v6 }
 0x4ed   :  { %v1086_v62 = vadd.f32 %v1051_v31, %v990_v34  ;;  %v993_v18 = vadd.f32 %v2121_v58, %v973_v24 }
 0x4ee   :  { %v1088_v52 = vadd.f32 %v1055_v14, %v992_v21 }
 0x4ef   :  { %v1102_v25 = vmax.f32 %v1086_v62, 0.0  ;;  %v1089_v22 = vadd.f32 %v1057_v15, %v993_v18 }
 0x4f0   :  { %v1104_v1 = vmax.f32 %v1088_v52, 0.0  ;;  %v1109_v20 = vpop.permute.xlu0 %1108 }
 0x4f1   :  { %v1440_v50 = vpack.c.bf16 %v1103_v12, %v1102_v25  ;;  %v1105_v16 = vmax.f32 %v1089_v22, 0.0 }
 0x4f3   :  { %1438 = vmatpush3.bf16.xpose.msk.msra.mxu0 %vm2136_vm6, %v1436_v37  ;;  %v1444_v9 = vpack.c.bf16 %v1105_v16, %v1104_v1 }
 0x4f4   :  { %1439 = vmatprep.subr.bf16.mxu0 %v1543_v39 }
 0x4fb   :  { %1442 = vmatpush3.bf16.xpose.msk.msra.mxu0 %vm2136_vm6, %v1440_v50 }
 0x4fc   :  { %1443 = vmatprep.subr.bf16.mxu0 %v1543_v39 }
 0x503   :  { %1446 = vmatpush3.bf16.xpose.msk.msra.mxu0 %vm2136_vm6, %v1444_v9 }
 0x50a   :  { %1413 = vmatmul.mubr.msk.f32.vlgmr.msra.gmra.mrb[0].mxu0 %vm744_vm5, %v27_v30 }
 0x5dd   :  { %v1228_v58 = vpop.f32.mrb[0].mxu0 }
 0x5de   :  { %v1229_v56 = vadd.f32 %v1228_v58, %v1109_v20  ;;  %v1414_v42 = vpop.f32.mrb[1].mxu0 }
 0x5e0   :  { %1232 = vst [vmem:[%s2221_s5] sm:$0x1] %v1229_v56 }

</bundles_post_ra>
